<compile_context>
chip_gen: v6e
topology: v6e:2x2x1
jax: 0.10.0
libtpu: 0.0.40
codegen_flags: <defaults>
</compile_context>

<pallas_src>
import jax
import jax.numpy as jnp
from jax.experimental import pallas as pl
from jax.experimental.pallas import tpu as pltpu


def _copy_kernel(x_ref, o_ref):
    # Whole-tile copy; the permutation lives in the BlockSpec index maps.
    o_ref[...] = x_ref[...]


def _target_block_bytes():
    # ~1/24 of VMEM keeps double-buffered in+out blocks comfortably inside the
    # budget: v7x (64 MiB) -> ~2.6 MiB blocks, v5e/v6e (128 MiB) -> ~5.3 MiB.
    try:
        cap = pltpu.get_tpu_info().vmem_capacity_bytes
    except Exception:
        cap = 64 * 1024 * 1024
    return max(2 * 1024 * 1024, cap // 24)


def _pick_lane_tile(hw, m_channels, itemsize, target_bytes):
    """Largest 128-multiple divisor L of hw with (m_channels, L) block around
    target_bytes; floored at 512 lanes so each strided HBM chunk stays big."""
    assert hw % 128 == 0
    if m_channels * hw * itemsize <= target_bytes:
        return hw
    max_lanes = max(512, target_bytes // (m_channels * itemsize))
    l = max(128, (min(max_lanes, hw) // 128) * 128)
    while l > 128 and hw % l != 0:
        l -= 128
    return l if hw % l == 0 else hw


def quantized_shuffle_channel(x, group):
    """Channel shuffle of an NCHW tensor `x` with `group` groups (Pallas TPU)."""
    n, c, h, w = x.shape
    assert isinstance(group, int), "group must be a static Python int"
    assert c % group == 0, "channels must be divisible by group"
    cpg = c // group

    if group == 1 or cpg == 1:
        # Shuffle is the identity: skip the kernel (and its HBM round trip).
        return x

    hw = h * w
    itemsize = jnp.dtype(x.dtype).itemsize

    x3 = x.reshape(n, c, hw)
    hw_p = hw
    if hw % 128 != 0:
        # Pad the lane axis to a 128 multiple: keeps stores unmasked and the
        # strided-side BlockSpec legal (e.g. 56*56, 28*28, 7*7 spatial sizes).
        # TODO(synk): a masked-tail kernel would avoid this extra pad/slice copy.
        hw_p = ((hw + 127) // 128) * 128
        x3 = jnp.pad(x3, ((0, 0), (0, 0), (0, hw_p - hw)))

    # Grid iterates over the smaller of (group, cpg); each block carries the
    # larger side's channels.
    s_steps = min(group, cpg)
    m_channels = max(group, cpg)

    lane_tile = _pick_lane_tile(hw_p, m_channels, itemsize, _target_block_bytes())
    lane_blocks = hw_p // lane_tile
    block_bytes = m_channels * lane_tile * itemsize

    if group <= cpg:
        # Contiguous side = input (cpg contiguous channels per step);
        # strided side = output (cpg chunks of lane_tile, stride group*hw_p).
        x_in = x3.reshape(n * group, cpg, hw_p)
        in_spec = pl.BlockSpec(
            (1, cpg, lane_tile), lambda ni, s, t: (ni * group + s, 0, t)
        )
        out_shape = jax.ShapeDtypeStruct((n, cpg, group * hw_p), x.dtype)
        out_spec = pl.BlockSpec(
            (1, cpg, lane_tile), lambda ni, s, t: (ni, 0, s * lane_blocks + t)
        )
    else:
        # Contiguous side = output (group contiguous channels per step);
        # strided side = input.
        x_in = x3.reshape(n, group, cpg * hw_p)
        in_spec = pl.BlockSpec(
            (1, group, lane_tile), lambda ni, s, t: (ni, 0, s * lane_blocks + t)
        )
        out_shape = jax.ShapeDtypeStruct((n * cpg, group, hw_p), x.dtype)
        out_spec = pl.BlockSpec(
            (1, group, lane_tile), lambda ni, s, t: (ni * cpg + s, 0, t)
        )

    out = pl.pallas_call(
        _copy_kernel,
        out_shape=out_shape,
        grid_spec=pltpu.PrefetchScalarGridSpec(
            num_scalar_prefetch=0,
            grid=(n, s_steps, lane_blocks),
            in_specs=[in_spec],
            out_specs=out_spec,
        ),
        compiler_params=pltpu.CompilerParams(
            # Every output block is written exactly once -> all axes parallel
            # (lets v7x's two TensorCores split this DMA-bound copy).
            dimension_semantics=("parallel", "parallel", "parallel"),
            vmem_limit_bytes=int(max(32 * 1024 * 1024, 6 * block_bytes)),
        ),
        cost_estimate=pl.CostEstimate(
            flops=0,
            transcendentals=0,
            bytes_accessed=2 * n * c * hw_p * itemsize,
        ),
    )(x_in)

    out = out.reshape(n, c, hw_p)
    if hw_p != hw:
        out = out[:, :, :hw]
    # NOTE: sub-32-bit dtypes (int8/bf16) are fine here because the kernel is a
    # whole-tile copy (no sub-pack-granularity strided access); a lane-axis
    # bitcast to 32-bit is not required with this formulation.
    # TODO(synk): per-channel quant scales/zero-points (if any) must be permuted
    # with the same (co % G)*cpg + co//G map outside this kernel.
    return out.reshape(n, c, h, w)


def _reference_shuffle(x, group):
    n, c, h, w = x.shape
    y = x.reshape(n, group, c // group, h, w)
    y = jnp.transpose(y, (0, 2, 1, 3, 4))
    return y.reshape(n, c, h, w)


if __name__ == "__main__":
    key = jax.random.PRNGKey(0)

    # Primary test: small NCHW input consistent with the module (group <= cpg path).
    N, C, H, W = 2, 4, 16, 16
    GROUP = 2
    x = jax.random.normal(key, (N, C, H, W), dtype=jnp.float32)

    out = jax.block_until_ready(quantized_shuffle_channel(x, GROUP))
    ref = _reference_shuffle(x, GROUP)
    assert out.shape == (N, C, H, W)
    assert out.dtype == x.dtype
    assert jnp.array_equal(out, ref), "Pallas channel shuffle mismatch vs reference"

    # Secondary check: cpg < group exercises the other formulation.
    x2 = jax.random.normal(jax.random.PRNGKey(1), (1, 8, 8, 16), dtype=jnp.float32)
    out2 = jax.block_until_ready(quantized_shuffle_channel(x2, 4))
    assert jnp.array_equal(out2, _reference_shuffle(x2, 4))

    # Degenerate case: group == 1 is an identity early-return (no kernel launch).
    x3 = jax.random.normal(jax.random.PRNGKey(2), (1, 4, 8, 16), dtype=jnp.float32)
    out3 = jax.block_until_ready(quantized_shuffle_channel(x3, 1))
    assert jnp.array_equal(out3, x3)

    print("KERNEL_OK")
</pallas_src>

<mosaic_0001>
module attributes {stable_mosaic.version = 11 : i64} {
  func.func @_copy_kernel(%arg0: i32, %arg1: i32, %arg2: i32, %arg3: memref<1x2x256xf32, #tpu.memory_space<vmem>>, %arg4: memref<1x2x256xf32, #tpu.memory_space<vmem>>) attributes {dimension_semantics = [#tpu.dimension_semantics<parallel>, #tpu.dimension_semantics<parallel>, #tpu.dimension_semantics<parallel>], iteration_bounds = array<i64: 2, 2, 1>, scalar_prefetch = 0 : i64, scratch_operands = 0 : i64, tpu.core_type = #tpu.core_type<tc>, window_params = [{transform_indices = @transform_0, window_bounds = array<i64: 1, 2, 256>}, {transform_indices = @transform_1, window_bounds = array<i64: 1, 2, 256>}]} {
    %c0 = arith.constant 0 : index
    %c0_0 = arith.constant 0 : index
    %c0_1 = arith.constant 0 : index
    %0 = vector.load %arg3[%c0, %c0_0, %c0_1] : memref<1x2x256xf32, #tpu.memory_space<vmem>>, vector<1x2x256xf32>
    %c0_2 = arith.constant 0 : index
    %c0_3 = arith.constant 0 : index
    %c0_4 = arith.constant 0 : index
    %1 = vector.load %arg4[%c0_2, %c0_3, %c0_4] : memref<1x2x256xf32, #tpu.memory_space<vmem>>, vector<1x2x256xf32>
    tpu.vector_store %arg4[%c0_2, %c0_3, %c0_4], %0 {strides = array<i32>} : memref<1x2x256xf32, #tpu.memory_space<vmem>>, vector<1x2x256xf32>,
    return
  }
  func.func @transform_0(%arg0: i32, %arg1: i32, %arg2: i32) -> (i32, i32, i32) {
    %c2_i32 = arith.constant 2 : i32
    %0 = arith.muli %arg0, %c2_i32 : i32
    %1 = arith.addi %0, %arg1 : i32
    %c0_i32 = arith.constant 0 : i32
    %c0_i32_0 = arith.constant 0 : i32
    return %1, %c0_i32, %arg2 : i32, i32, i32
  }
  func.func @transform_1(%arg0: i32, %arg1: i32, %arg2: i32) -> (i32, i32, i32) {
    %c1_i32 = arith.constant 1 : i32
    %0 = arith.muli %arg1, %c1_i32 : i32
    %1 = arith.addi %0, %arg2 : i32
    %c0_i32 = arith.constant 0 : i32
    %c0_i32_0 = arith.constant 0 : i32
    return %arg0, %c0_i32, %1 : i32, i32, i32
  }
}

</mosaic_0001>

<bundles_post_ra>
// kernel: tpu_custom_call.1
= control target key start
LH: loop header
LB: loop body
LE: loop exit
PB: predicated region body
PF: predicated region fallthrough
CT: control target
= control target key end

     0   :  { %s767_s0 = inlined_call_operand.hbm [shape: f32[4,2,256], index: 0, kind: input, shape index: {}]   ;;  %s768_s1 = inlined_call_operand.hbm [shape: f32[2,2,512], index: 1, kind: output, shape index: {}]  }
   0x1   :  { %769 = sst [smem:[#allocation8_spill]] %s767_s0 }
   0x2   :  { %6 = vsyncpa [#allocation3], 0 }
   0x3   :  { %8 = vsyncpa [#allocation3 + $0x1], 0 }
   0x4   :  { %9 = vsyncpa [#allocation4], 0 }
   0x5   :  { %11 = vsyncpa [#allocation4 + $0x1], 0  ;;  %s568_s6 = smov 0   ;;  %s570_s7 = smov 0  }
   0x6   :  { %s572_s8 = smov 0   ;;  %s574_s9 = smov 0  }
   0x7   :  { %s576_s10 = smov 0   ;;  %s578_s11 = smov 0  }
   0x8   :  { %s580_s12 = smov 0   ;;  %s582_s13 = smov 0  }
   0x9   :  { %s584_s14 = smov 0   ;;  %s586_s15 = smov 0  }
   0xa   :  { %s588_s16 = smov 0  }
   0xb LB: > { %s284_s17 = sadd.s32 4294967295, %s554_s16   ;;  %s285_s18 = sadd.s32 4294967294, %s554_s16   ;;  %s554_s16 = sphi %s588_s16, %s17_s16   ;;  %s550_s15 = sphi %s586_s15, %s786_s15   ;;  %s546_s14 = sphi %s584_s14, %s785_s14   ;;  %s542_s13 = sphi %s582_s13, %s784_s13   ;;  %s538_s12 = sphi %s580_s12, %s783_s12   ;;  %s534_s11 = sphi %s578_s11, %s782_s11   ;;  %s530_s10 = sphi %s576_s10, %s781_s10   ;;  %s526_s9 = sphi %s574_s9, %s780_s9   ;;  %s522_s8 = sphi %s572_s8, %s779_s8   ;;  %s518_s7 = sphi %s570_s7, %s778_s7   ;;  %s514_s6 = sphi %s568_s6, %s777_s6  }
   0xc   : > { %s32_s19 = sadd.s32 1, %s546_s14  ;;  %s36_s20 = sadd.s32 1, %s550_s15 }
   0xd   : > { %p34_p0 = scmp.ge.s32.totalorder %s32_s19, 2  ;;  %s286_s21 = sshll.u32 %s550_s15, 1 }
   0xe   : > { %s627_s22 = sadd.s32 %s546_s14, %s286_s21  ;;  %s49_s23 = sadd.s32 1, %s534_s11 }
   0xf   : > { %s788_s19 = smov (%p34_p0, %s32_s19), 0  ;;  %s790_s20 = smov (!%p34_p0, %s36_s20), %s550_s15 }
  0x10   : > { %p56_p1 = scmp.ne.s32.totalorder %s534_s11, %s530_s10  ;;  %p57_p2 = scmp.eq.s32.totalorder %s554_s16, 0 }
  0x11   : > { %p38_p3 = scmp.ge.s32.totalorder %s790_s20, 2  ;;  %p62_p4 = scmp.ne.s32.totalorder %s530_s10, %s526_s9 }
  0x12   : > { %p637_p5 = por %p57_p2, %p56_p1  ;;  %p63_p6 = scmp.eq.s32.totalorder %s284_s17, 0 }
  0x13   : > { %s792_s20 = smov (%p38_p3, %s790_s20), 0  ;;  %s75_s26 = ssub.s32 %s546_s14, %s788_s19 }
  0x14   : > { %p645_p7 = por %p63_p6, %p62_p4  ;;  %s287_s27 = sshll.u32 %s792_s20, 1 }
  0x15   : > { %s74_s28 = ssub.s32 %s550_s15, %s792_s20  ;;  %s43_s29 = sadd.s32 %s287_s27, %s788_s19 }
  0x16   : > { %s76_s30 = sor.u32 %s75_s26, %s74_s28  ;;  %s44_s2 = ssub.s32 %s627_s22, %s43_s29 }
  0x17   : > { %p77_p8 = scmp.eq.s32.totalorder %s76_s30, 0  ;;  %p47_p9 = scmp.eq.s32.totalorder %s44_s2, 0 }
  0x18   : > { %s79_s3 = sadd.s32 1, %s522_s8  ;;  %p89_p10 = scmp.ne.s32.totalorder %s522_s8, %s518_s7 }
  0x19   : > { %s658_s4 = scalar_select %p77_p8, %s522_s8, %s79_s3  }
  0x1a   : > { %s661_s5 = scalar_select %p47_p9, %s534_s11, %s49_s23  }
  0x1b   : > { %p90_p11 = scmp.eq.s32.totalorder %s284_s17, 3  ;;  %p95_p12 = scmp.ne.s32.totalorder %s518_s7, %s514_s6 }
  0x1c   : > { %p96_p13 = scmp.eq.s32.totalorder %s285_s18, 3  ;;  %p316_p2 = scmp.lt.s32.totalorder %s554_s16, 4 }
  0x1d   : > { %p671_p0 = por %p90_p11, %p89_p10  ;;  %s116_s26 = sand.u32 1, %s534_s11  }
  0x1e   : > { %p675_p1 = por %p96_p13, %p95_p12  ;;  %s303_s23 = sshll.u32 %s627_s22, 6 }
  0x1f   : > { %s290_s27 = sshll.u32 %s116_s26, 2  ;;  %s774_s0 = sld [smem:[#allocation8_spill]] }
  0x20   : > { %s773_s21 = scalar_select %p675_p1, 1, 0 }
  0x21   : > { %s120_s17 = scalar_lea.vmem [#allocation2], %s290_s27  ;;  %p687_p3 = pnand %p316_p2, %p637_p5 }
  0x22   : > { %s132_s2 = sshll.u32 %s120_s17, 4  ;;  %p294_p4 = scmp.ge.s32.totalorder %s554_s16, 1  ;;  %s133_s2 = int_to_ptr.vmem [resolvable:$true] %s132_s2 }
  0x23   : > { %p137_p6 = scmp.lt.s32.totalorder %s554_s16, 5  ;;  %s117_s3 = scalar_lea.sflag [#allocation3], %s116_s26 }
  0x24   : > { %p408_p8 = pneg %p687_p3  ;;  %s419_s22 = scalar_lea.vmem %s133_s2, 64 }
  0x25   : > { %s130_s30 = scalar_lea.hbm %s774_s0, %s303_s23  ;;  %p420_p9 = scmp.ne.s32.totalorder %s133_s2, %s419_s22 }
  0x26   : > { %s556_s28 = smov [#allocation2]  }
  0x27   : > { %p422_p10 = pnand %p420_p9, %p408_p8  ;;  %s424_s23 = sshll.u32 %s556_s28, 4  ;;  %s425_s23 = int_to_ptr.vmem [resolvable:$false] %s424_s23 }
  0x28   : > { %s426_s27 = scalar_lea.vmem %s425_s23, 128  ;;  %p427_p12 = scmp.lt.s32.totalorder %s133_s2, %s425_s23 }
  0x29   : > { %p423_p11 = pneg %p422_p10  ;;  %p428_p5 = scmp.lt.s32.totalorder %s426_s27, %s419_s22 }
  0x2b   : > { %p429_p13 = por %p428_p5, %p427_p12 }
  0x2d   : > { %p430_p2 = pnand %p429_p13, %p423_p11 }
  0x2f   : > { %433 = shalt.err (!%p430_p2)
}
  0x30   : > { %311 = dma.hbm_to_vmem [thread:$0]  (!%p687_p3), %s130_s30, 64, %s133_s2, %s117_s3  }
  0x31   : > { %p138_p1 = pnand %p294_p4, %p137_p6 }
  0x32   : > { %s143_s24 = sand.u32 (!%p138_p1), 1, %s530_s10  }
  0x33   : > { %141 = sbr.rel (%p138_p1) target bundleno = 83 (0x53), region = 24  ;;  %s295_s26 = sshll.u32 (!%p138_p1), %s143_s24, 2 }
  0x34   : > { %s144_s29 = scalar_lea.sflag (!%p138_p1), [#allocation3], %s143_s24  ;;  %s147_s17 = scalar_lea.vmem (!%p138_p1), [#allocation2], %s295_s26 }
  0x38   : > { %505 = dma.done.wait (%p645_p7), %s144_s29, 64  }
  0x39   : > { %507 = vsyncadd (%p645_p7), %s144_s29, 4294967232  ;;  %s163_s30 = sand.u32 1, %s518_s7   ;;  %s298_s2 = sshll.u32 %s538_s12, 1  ;;  %v171_v0 = vld [vmem:[%s147_s17] sm:$0xf] }
  0x3a   : > { %s296_s18 = sshll.u32 %s163_s30, 2  ;;  %s299_s3 = sshll.u32 %s542_s13, 2 }
  0x3b   : > { %s165_s22 = scalar_lea.vmem [#allocation5], %s296_s18  ;;  %s187_s23 = sadd.s32 %s299_s3, %s298_s2 }
  0x3c   : > { %s191_s28 = sshll.u32 %s165_s22, 4  ;;  %s300_s27 = sshll.u32 %s187_s23, 5  ;;  %172 = vst [vmem:[%s165_s22] sm:$0xf] %v171_v0  ;;  %s709_s28 = int_to_ptr.vmem [resolvable:$true] %s191_s28 }
  0x3d   : > { %s189_s25 = scalar_lea.hbm %s768_s1, %s300_s27  ;;  %s174_s29 = scalar_lea.sflag [#allocation4], %s163_s30 }
  0x3e   : > { %s434_s0 = scalar_lea.vmem %s709_s28, 64  ;;  %s557_s12 = smov [#allocation5]  }
  0x3f   : > { %p435_p7 = scmp.ne.s32.totalorder %s709_s28, %s434_s0  ;;  %s438_s13 = sshll.u32 %s557_s12, 4  ;;  %s439_s13 = int_to_ptr.vmem [resolvable:$false] %s438_s13 }
  0x40   : > { %s440_s2 = scalar_lea.vmem %s439_s13, 128  ;;  %p441_p4 = scmp.lt.s32.totalorder %s709_s28, %s439_s13 }
  0x41   : > { %p436_p1 = pnand %p435_p7, %p671_p0  ;;  %p442_p6 = scmp.lt.s32.totalorder %s440_s2, %s434_s0 }
  0x43   : > { %p437_p3 = pneg %p436_p1  ;;  %p443_p8 = por %p442_p6, %p441_p4 }
  0x45   : > { %p444_p9 = pnand %p443_p8, %p437_p3 }
  0x47   : > { %447 = shalt.err (!%p444_p9)
}
  0x48   : > { %s448_s18 = scalar_lea.hbm %s189_s25, 64  ;;  %s452_s3 = scalar_lea.hbm %s768_s1, 256 }
  0x49   : > { %p449_p10 = scmp.ne.s32.totalorder %s189_s25, %s448_s18  ;;  %p453_p5 = scmp.lt.s32.totalorder %s189_s25, %s768_s1 }
  0x4a   : > { %p454_p13 = scmp.lt.s32.totalorder %s452_s3, %s448_s18 }
  0x4b   : > { %p450_p11 = pnand %p449_p10, %p671_p0 }
  0x4c   : > { %p455_p2 = por %p454_p13, %p453_p5 }
  0x4d   : > { %p451_p12 = pneg %p450_p11 }
  0x4f   : > { %p456_p7 = pnand %p455_p2, %p451_p12 }
  0x51   : > { %459 = shalt.err (!%p456_p7)
}
  0x52   : > { %306 = dma.vmem_to_hbm [thread:$0]  (%p671_p0), %s709_s28, 64, %s189_s25, %s174_s29  }
  0x53 PF: > { %p317_p1 = scmp.ge.s32.totalorder %s554_s16, 2  ;;  %s203_s0 = sand.u32 1, %s514_s6  }
  0x54   : > { %p776_p3 = scmp.ne.s32.totalorder %s773_s21, 0  ;;  %s204_s27 = scalar_lea.sflag [#allocation4], %s203_s0 }
  0x56   : > { %p313_p4 = pnand %p317_p1, %p776_p3 }
  0x58   : > { %p314_p6 = pneg %p313_p4 }
  0x5a   : > { %509 = dma.done.wait (%p314_p6), %s204_s27, 64  }
  0x5b   : > { %511 = vsyncadd (%p314_p6), %s204_s27, 4294967232  ;;  %s17_s16 = sadd.s32 1, %s554_s16   ;;  %s777_s6 = smov %s518_s7 }
  0x5c   : > { %p14_p8 = scmp.ge.s32.totalorder %s17_s16, 6   ;;  %s778_s7 = smov %s522_s8 }
  0x5d   : > { %s779_s8 = smov %s658_s4  ;;  %s780_s9 = smov %s530_s10 }
  0x5e   : > { %s781_s10 = smov %s534_s11  ;;  %s782_s11 = smov %s661_s5 }
  0x5f   : > { %s783_s12 = smov %s546_s14  ;;  %s784_s13 = smov %s550_s15 }
  0x60   : > { %s785_s14 = smov %s788_s19  ;;  %s786_s15 = smov %s792_s20 }
  0x61   :  { %16 = sbr.rel (!%p14_p8) target bundleno = 11 (0xb), region = 69 }
  0x66   :  { %209 = vsyncpa [#allocation3], 1 }
  0x67   :  { %211 = vsyncpa [#allocation3 + $0x1], 1 }
  0x68   :  { %212 = vsyncpa [#allocation4], 1 }
  0x69   :  { %214 = vsyncpa [#allocation4 + $0x1], 1 }

</bundles_post_ra>
